<compile_context>
chip_gen: v7x
topology: tpu7x:2x2x1
jax: 0.10.0
libtpu: 0.0.40
codegen_flags: <defaults>
</compile_context>

<pallas_src>
import jax
import jax.numpy as jnp
from jax.experimental import pallas as pl
from jax.experimental.pallas import tpu as pltpu


def _mahalanobis_kernel(x_ref, y_ref, m_ref, o_ref):
    # Hot path: elementwise diff, square, diagonal-metric weight, lane reduce.
    d = x_ref[...] - y_ref[...]                # (TB, H)
    wd2 = (d * d) * m_ref[...]                 # (1, H) broadcast over rows
    s = jnp.sum(wd2, axis=-1)                  # (TB,) per-row distance
    o_ref[...] = s[None, None, :]              # lane-dense (1, 1, TB) store


def _pick_tile_b(batch, hidden, requested, vmem_budget_bytes=8 << 20):
    """Largest batch tile (multiple of 8) whose double-buffered x+y input
    blocks fit a conservative VMEM budget: 2 inputs * 2 bufs * tile * H * 4 B."""
    max_rows = max(8, vmem_budget_bytes // (4 * hidden * 4))
    batch_pad8 = -(-batch // 8) * 8
    tile = min(requested, max_rows, batch_pad8)
    return max(8, (tile // 8) * 8)


def mahalanobis_distance(x, y, m, *, tile_b=1024):
    """x, y: (B, H); m: (1, H)  ->  (B,) float32 diagonal-Mahalanobis distances."""
    B, H = x.shape
    assert y.shape == (B, H) and m.shape == (1, H)
    x = x.astype(jnp.float32)
    y = y.astype(jnp.float32)
    m = m.astype(jnp.float32)

    tile = _pick_tile_b(B, H, tile_b)
    num_tiles = pl.cdiv(B, tile)
    b_pad = num_tiles * tile
    if b_pad != B:  # zero-pad ragged batch; padded rows are sliced off below
        x = jnp.pad(x, ((0, b_pad - B), (0, 0)))
        y = jnp.pad(y, ((0, b_pad - B), (0, 0)))

    # TODO(synk): for very large hidden sizes (>= ~4096) add a second
    # "arbitrary" grid axis over H with a partial-sum accumulator; at the
    # module's H=128 the row cap above keeps tiles VMEM-friendly.
    out = pl.pallas_call(
        _mahalanobis_kernel,
        out_shape=jax.ShapeDtypeStruct((num_tiles, 1, tile), jnp.float32),
        grid_spec=pl.GridSpec(
            grid=(num_tiles,),
            in_specs=[
                pl.BlockSpec((tile, H), lambda i: (i, 0)),   # x tile
                pl.BlockSpec((tile, H), lambda i: (i, 0)),   # y tile
                pl.BlockSpec((1, H), lambda i: (0, 0)),      # metric (resident)
            ],
            out_specs=pl.BlockSpec((1, 1, tile), lambda i: (i, 0, 0)),
        ),
        compiler_params=pltpu.CompilerParams(
            dimension_semantics=("parallel",),
        ),
    )(x, y, m)
    return out.reshape(-1)[:B]


if __name__ == "__main__":
    hidden_size = 128   # module default
    batch = 8

    # Deterministic parameter init matching nn.Module __init__: ones(1, hidden).
    m = jnp.ones((1, hidden_size), dtype=jnp.float32)

    key = jax.random.PRNGKey(0)
    kx, ky = jax.random.split(key)
    x = jax.random.normal(kx, (batch, hidden_size), dtype=jnp.float32)
    y = jax.random.normal(ky, (batch, hidden_size), dtype=jnp.float32)

    dist = jax.block_until_ready(mahalanobis_distance(x, y, m))
    ref = jnp.sum(m * (x - y) ** 2, axis=-1)
    assert dist.shape == (batch,)
    assert jnp.allclose(dist, ref, rtol=1e-5, atol=1e-5), (dist, ref)

    # Ragged-batch check (exercises the cdiv grid + padding path).
    batch2 = 37
    kx2, ky2 = jax.random.split(jax.random.PRNGKey(1))
    x2 = jax.random.normal(kx2, (batch2, hidden_size), dtype=jnp.float32)
    y2 = jax.random.normal(ky2, (batch2, hidden_size), dtype=jnp.float32)
    dist2 = jax.block_until_ready(mahalanobis_distance(x2, y2, m))
    ref2 = jnp.sum(m * (x2 - y2) ** 2, axis=-1)
    assert dist2.shape == (batch2,)
    assert jnp.allclose(dist2, ref2, rtol=1e-5, atol=1e-5), (dist2, ref2)

    print("KERNEL_OK")
</pallas_src>

<mosaic_0001>
module attributes {stable_mosaic.version = 11 : i64} {
  func.func @_mahalanobis_kernel(%arg0: i32, %arg1: memref<8x128xf32, #tpu.memory_space<vmem>>, %arg2: memref<8x128xf32, #tpu.memory_space<vmem>>, %arg3: memref<1x128xf32, #tpu.memory_space<vmem>>, %arg4: memref<1x1x8xf32, #tpu.memory_space<vmem>>) attributes {dimension_semantics = [#tpu.dimension_semantics<parallel>], iteration_bounds = array<i64: 1>, scalar_prefetch = 0 : i64, scratch_operands = 0 : i64, tpu.core_type = #tpu.core_type<tc>, window_params = [{transform_indices = @transform_0, window_bounds = array<i64: 8, 128>}, {transform_indices = @transform_1, window_bounds = array<i64: 8, 128>}, {pipeline_mode = #tpu.pipeline_mode<synchronous>, transform_indices = @transform_2, window_bounds = array<i64: 1, 128>}, {transform_indices = @transform_3, window_bounds = array<i64: 1, 1, 8>}]} {
    %c0 = arith.constant 0 : index
    %c0_0 = arith.constant 0 : index
    %0 = vector.load %arg1[%c0, %c0_0] : memref<8x128xf32, #tpu.memory_space<vmem>>, vector<8x128xf32>
    %c0_1 = arith.constant 0 : index
    %c0_2 = arith.constant 0 : index
    %1 = vector.load %arg2[%c0_1, %c0_2] : memref<8x128xf32, #tpu.memory_space<vmem>>, vector<8x128xf32>
    %2 = arith.subf %0, %1 : vector<8x128xf32>
    %3 = arith.mulf %2, %2 : vector<8x128xf32>
    %c0_3 = arith.constant 0 : index
    %c0_4 = arith.constant 0 : index
    %4 = vector.load %arg3[%c0_3, %c0_4] : memref<1x128xf32, #tpu.memory_space<vmem>>, vector<1x128xf32>
    %5 = vector.broadcast %4 : vector<1x128xf32> to vector<8x128xf32>
    %6 = arith.mulf %3, %5 : vector<8x128xf32>
    %cst = arith.constant dense<0.000000e+00> : vector<8xf32>
    %7 = vector.multi_reduction <add>, %6, %cst [1] : vector<8x128xf32> to vector<8xf32>
    %8 = vector.shape_cast %7 : vector<8xf32> to vector<1x1x8xf32>
    %c0_5 = arith.constant 0 : index
    %c0_6 = arith.constant 0 : index
    %c0_7 = arith.constant 0 : index
    %9 = vector.load %arg4[%c0_5, %c0_6, %c0_7] : memref<1x1x8xf32, #tpu.memory_space<vmem>>, vector<1x1x8xf32>
    tpu.vector_store %arg4[%c0_5, %c0_6, %c0_7], %8 {strides = array<i32>} : memref<1x1x8xf32, #tpu.memory_space<vmem>>, vector<1x1x8xf32>,
    return
  }
  func.func @transform_0(%arg0: i32) -> (i32, i32) {
    %c0_i32 = arith.constant 0 : i32
    %c0_i32_0 = arith.constant 0 : i32
    return %arg0, %c0_i32 : i32, i32
  }
  func.func @transform_1(%arg0: i32) -> (i32, i32) {
    %c0_i32 = arith.constant 0 : i32
    %c0_i32_0 = arith.constant 0 : i32
    return %arg0, %c0_i32 : i32, i32
  }
  func.func @transform_2(%arg0: i32) -> (i32, i32) {
    %c0_i32 = arith.constant 0 : i32
    %c0_i32_0 = arith.constant 0 : i32
    %c0_i32_1 = arith.constant 0 : i32
    return %c0_i32, %c0_i32_0 : i32, i32
  }
  func.func @transform_3(%arg0: i32) -> (i32, i32, i32) {
    %c0_i32 = arith.constant 0 : i32
    %c0_i32_0 = arith.constant 0 : i32
    %c0_i32_1 = arith.constant 0 : i32
    return %arg0, %c0_i32, %c0_i32_0 : i32, i32, i32
  }
}

</mosaic_0001>

<bundles_post_ra>
// kernel: tpu_custom_call.1
= control target key start
LH: loop header
LB: loop body
LE: loop exit
PB: predicated region body
PF: predicated region fallthrough
CT: control target
= control target key end

     0   :  { %8 = vsyncpa [#allocation3], 0  ;;  %s217_s0 = inlined_call_operand.hbm [shape: f32[8,128], index: 0, kind: input, shape index: {}]   ;;  %s218_s1 = inlined_call_operand.hbm [shape: f32[8,128], index: 1, kind: input, shape index: {}]   ;;  %s219_s2 = inlined_call_operand.vmem [shape: f32[1,128], index: 2, kind: input, shape index: {}]   ;;  %s220_s3 = inlined_call_operand.hbm [shape: f32[1,1,8], index: 3, kind: output, shape index: {}]  }
   0x1   :  { %9 = vsyncpa [#allocation6], 0 }
   0x2   :  { %10 = vsyncpa [#allocation4], 0  ;;  %s155_s12 = smov [#allocation2]   ;;  %s156_s14 = smov [#allocation5]  }
   0x3   :  { %s17_s13 = sshll.u32 %s155_s12, 4  ;;  %s27_s15 = sshll.u32 %s156_s14, 4  ;;  %s18_s13 = int_to_ptr.vmem [resolvable:$true] %s17_s13  ;;  %s28_s15 = int_to_ptr.vmem [resolvable:$true] %s27_s15 }
   0x4   :  { %s83_s18 = scalar_lea.hbm %s217_s0, 128 }
   0x5   :  { %p84_p0 = scmp.ne.s32.totalorder %s217_s0, %s83_s18  ;;  %p87_p1 = scmp.lt.u32.totalorder %s83_s18, %s217_s0 }
   0x7   :  { %p89_p2 = pnand %p87_p1, %p84_p0 }
   0x9   :  { %92 = shalt.err (!%p89_p2)
}
   0xa   :  { %s93_s23 = scalar_lea.vmem %s18_s13, 128  ;;  %p98_p4 = scmp.lt.s32.totalorder %s18_s13, %s18_s13 }
   0xb   :  { %p94_p3 = scmp.ne.s32.totalorder %s18_s13, %s93_s23  ;;  %p99_p5 = scmp.lt.s32.totalorder %s93_s23, %s93_s23 }
   0xd   :  { %p100_p6 = por %p99_p5, %p98_p4 }
   0xf   :  { %p101_p7 = pnand %p100_p6, %p94_p3 }
  0x11   :  { %104 = shalt.err (!%p101_p7)
}
  0x12   :  { %20 = dma.hbm_to_vmem [thread:$0]  %s217_s0, 128, %s18_s13, [#allocation3]  }
  0x13   :  { %s105_s28 = scalar_lea.hbm %s218_s1, 128 }
  0x14   :  { %p106_p8 = scmp.ne.s32.totalorder %s218_s1, %s105_s28  ;;  %p109_p9 = scmp.lt.u32.totalorder %s105_s28, %s218_s1 }
  0x16   :  { %p111_p10 = pnand %p109_p9, %p106_p8 }
  0x18   :  { %114 = shalt.err (!%p111_p10)
}
  0x19   :  { %s115_s6 = scalar_lea.vmem %s28_s15, 128  ;;  %p120_p12 = scmp.lt.s32.totalorder %s28_s15, %s28_s15 }
  0x1a   :  { %p116_p11 = scmp.ne.s32.totalorder %s28_s15, %s115_s6  ;;  %p121_p13 = scmp.lt.s32.totalorder %s115_s6, %s115_s6 }
  0x1c   :  { %p122_p0 = por %p121_p13, %p120_p12 }
  0x1e   :  { %p123_p1 = pnand %p122_p0, %p116_p11 }
  0x20   :  { %126 = shalt.err (!%p123_p1)
}
  0x21   :  { %30 = dma.hbm_to_vmem [thread:$0]  %s218_s1, 128, %s28_s15, [#allocation6]  }
  0x22   :  { %149 = dma.done.wait [#allocation3], 128  }
  0x23   :  { %150 = vsyncadd [#allocation3], 4294967168 }
  0x24   :  { %151 = dma.done.wait [#allocation6], 128  }
  0x25   :  { %152 = vsyncadd [#allocation6], 4294967168  ;;  %v39_v0 = vld [vmem:[#allocation2] sm:$0xff]  ;;  %v40_v1 = vld [vmem:[#allocation5] sm:$0xff]  ;;  %v54_v6 = vlaneseq  ;;  %s157_s10 = smov [#allocation7]   ;;  %vm61_vm0 = vcmask 57344  }
  0x26   :  { %v41_v2 = vsub.f32 %v39_v0, %v40_v1  ;;  %v79_v3 = vld [vmem:[%s219_s2] ss:$0 sm:$0xff]  ;;  %s69_s1 = sshll.u32 %s157_s10, 4  ;;  %s70_s1 = int_to_ptr.vmem [resolvable:$true] %s69_s1 }
  0x27   :  { %v55_v7 = vand.u32 127, %v54_v6  ;;  %v57_v8 = vshrl.u32 %v54_v6, 7  ;;  %s127_s11 = scalar_lea.vmem %s70_s1, 16  ;;  %s131_s12 = scalar_lea.vmem %s70_s1, 32 }
  0x28   :  { %v42_v4 = vmul.f32 %v41_v2, %v41_v2  ;;  %p128_p2 = scmp.ne.s32.totalorder %s70_s1, %s127_s11  ;;  %p132_p3 = scmp.lt.s32.totalorder %s70_s1, %s70_s1 }
  0x29   :  { %v58_v9 = vsub.s32 %v55_v7, %v57_v8  ;;  %p133_p4 = scmp.lt.s32.totalorder %s131_s12, %s127_s11 }
  0x2a   :  { %v50_v5 = vmul.f32 %v79_v3, %v42_v4 }
  0x2b   :  { %p134_p5 = por %p133_p4, %p132_p3 }
  0x2c   :  { %51 = vadd.xlane.f32.xlu0 %v50_v5 }
  0x2d   :  { %p135_p6 = pnand %p134_p5, %p128_p2 }
  0xb9   :  { %v52_v10 = vpop.xlane.xlu0 %51 }
  0xba   :  { %v59_v11 = vrot.slane %v52_v10, %v58_v9 }
  0xbc   :  { %62 = vst.msk [vmem:[#allocation7] sm:$0x1] %vm61_vm0, %v59_v11 }
  0xbd   :  { %138 = shalt.err (!%p135_p6)
}
  0xbe   :  { %s139_s14 = scalar_lea.hbm %s220_s3, 16 }
  0xbf   :  { %p140_p7 = scmp.ne.s32.totalorder %s220_s3, %s139_s14  ;;  %p143_p8 = scmp.lt.u32.totalorder %s139_s14, %s220_s3 }
  0xc1   :  { %p145_p9 = pnand %p143_p8, %p140_p7 }
  0xc3   :  { %148 = shalt.err (!%p145_p9)
}
  0xc4   :  { %72 = dma.vmem_to_hbm [thread:$0]  %s70_s1, 16, %s220_s3, [#allocation4]  }
  0xc5   :  { %153 = dma.done.wait [#allocation4], 16  }
  0xc6   :  { %154 = vsyncadd [#allocation4], 4294967280 }
  0xc7   :  { %76 = vsyncpa [#allocation3], 1 }
  0xc8   :  { %77 = vsyncpa [#allocation6], 1 }
  0xc9   :  { %78 = vsyncpa [#allocation4], 1 }

</bundles_post_ra>
